<compile_context>
chip_gen: v5e
topology: v5e:2x2
jax: 0.10.0
libtpu: 0.0.40
codegen_flags: <defaults>
</compile_context>

<pallas_src>
import functools
import math

import jax
import jax.numpy as jnp
from jax.experimental import pallas as pl
from jax.experimental.pallas import tpu as pltpu

_LANE = 128
_MAX_TILE_BYTES = 2 * 1024 * 1024  # ~2 MiB per block (x2 buffers x in/out << VMEM)


def _drop_path_kernel(keep_ref, x_ref, o_ref, *, inv_keep_prob):
    """Scale this sample's tile by 1/keep_prob (kept) or 0 (dropped)."""
    b = pl.program_id(0)
    keep = keep_ref[b]  # int32 scalar, read from SMEM (scalar prefetch)
    scale = jnp.where(keep != 0,
                      jnp.float32(inv_keep_prob),
                      jnp.float32(0.0)).astype(o_ref.dtype)
    o_ref[...] = x_ref[...] * scale


def drop_path(x, drop_prob=0.1, training=False, *, key=None, seed=0):
    """Pallas TPU DropPath; matches timm drop_path(x, drop_prob, training)."""
    if drop_prob == 0.0 or not training:
        return x  # identity path, same object as the torch reference
    keep_prob = 1.0 - drop_prob

    if key is None:
        key = jax.random.PRNGKey(seed)

    orig_shape = x.shape
    b = orig_shape[0]
    n = math.prod(orig_shape[1:])

    # Per-sample Bernoulli(keep_prob):  mask = floor(keep_prob + U[0,1))
    u = jax.random.uniform(key, (b,), dtype=jnp.float32)
    keep = (u + keep_prob >= 1.0).astype(jnp.int32)  # (B,) int32 -> SMEM prefetch

    # Lane-dense (B, R, 128) view. Copy-free when n % 128 == 0 (common case);
    # otherwise pad only the ragged lanes (<=127 columns) once.
    lane_pad = (-n) % _LANE
    xf = x.reshape(b, n)
    if lane_pad:
        # TODO(synk): ragged-lane tail could use an in-kernel masked store
        # instead of this (small) pad + slice.
        xf = jnp.pad(xf, ((0, 0), (0, lane_pad)))
    n_pad = n + lane_pad
    r = n_pad // _LANE
    xf = xf.reshape(b, r, _LANE)

    # Dtype-aware tile sizing: ~2 MiB per block. max_rows is automatically a
    # multiple of the native sublane tile (8 f32 / 16 bf16 / 32 int8). If the
    # whole row extent fits, use it directly (block == full dim is always
    # legal and leaves no ragged blocks); Pallas clips the last block when it
    # doesn't divide evenly.
    itemsize = jnp.dtype(x.dtype).itemsize
    max_rows = _MAX_TILE_BYTES // (_LANE * itemsize)
    block_rows = r if r <= max_rows else max_rows
    grid = (b, pl.cdiv(r, block_rows))

    out = pl.pallas_call(
        functools.partial(_drop_path_kernel, inv_keep_prob=1.0 / keep_prob),
        out_shape=jax.ShapeDtypeStruct((b, r, _LANE), x.dtype),
        grid_spec=pltpu.PrefetchScalarGridSpec(
            num_scalar_prefetch=1,
            grid=grid,
            in_specs=[pl.BlockSpec((1, block_rows, _LANE),
                                   lambda i, j, _keep: (i, j, 0))],
            out_specs=pl.BlockSpec((1, block_rows, _LANE),
                                   lambda i, j, _keep: (i, j, 0)),
        ),
        compiler_params=pltpu.CompilerParams(
            dimension_semantics=("parallel", "parallel")),
    )(keep, xf)

    if lane_pad:
        out = out.reshape(b, n_pad)[:, :n]
    return out.reshape(orig_shape)


if __name__ == "__main__":
    key = jax.random.PRNGKey(0)
    B, C, H, W = 2, 4, 16, 16
    x = jax.random.normal(key, (B, C, H, W), dtype=jnp.float32)

    drop_prob = 0.1  # DropPath default
    keep_prob = 1.0 - drop_prob

    # eval / drop_prob==0 path: exact identity, same as torch.
    assert drop_path(x, drop_prob, training=False) is x
    assert drop_path(x, 0.0, training=True) is x

    # training path via the Pallas kernel.
    y = jax.block_until_ready(drop_path(x, drop_prob, training=True, seed=0))
    assert y.shape == x.shape and y.dtype == x.dtype
    assert bool(jnp.all(jnp.isfinite(y)))

    # Each sample must be either fully dropped (zeros) or scaled by 1/keep_prob.
    xf, yf = x.reshape(B, -1), y.reshape(B, -1)
    for i in range(B):
        kept = bool(jnp.allclose(yf[i], xf[i] / keep_prob, rtol=1e-5, atol=1e-5))
        dropped = bool(jnp.allclose(yf[i], 0.0))
        assert kept or dropped

    # Heavier-drop sanity check on a bigger batch (exercises both branches).
    x8 = jax.random.normal(jax.random.PRNGKey(1), (8, C, H, W), dtype=jnp.float32)
    y8 = jax.block_until_ready(drop_path(x8, 0.5, training=True, seed=123))
    x8f, y8f = x8.reshape(8, -1), y8.reshape(8, -1)
    for i in range(8):
        kept = bool(jnp.allclose(y8f[i], x8f[i] / 0.5, rtol=1e-5, atol=1e-5))
        dropped = bool(jnp.allclose(y8f[i], 0.0))
        assert kept or dropped

    # bf16 path (native-dtype multiply in-kernel).
    xb = jax.random.normal(jax.random.PRNGKey(2), (4, C, H, W), dtype=jnp.bfloat16)
    yb = jax.block_until_ready(drop_path(xb, 0.25, training=True, seed=7))
    xbf = xb.astype(jnp.float32).reshape(4, -1)
    ybf = yb.astype(jnp.float32).reshape(4, -1)
    for i in range(4):
        kept = bool(jnp.allclose(ybf[i], xbf[i] / 0.75, rtol=2e-2, atol=2e-2))
        dropped = bool(jnp.allclose(ybf[i], 0.0))
        assert kept or dropped

    print("KERNEL_OK")
</pallas_src>

<mosaic_0001>
module attributes {stable_mosaic.version = 11 : i64} {
  func.func @_drop_path_kernel(%arg0: i32, %arg1: i32, %arg2: memref<2xi32, #tpu.memory_space<smem>>, %arg3: memref<1x8x128xf32, #tpu.memory_space<vmem>>, %arg4: memref<1x8x128xf32, #tpu.memory_space<vmem>>) attributes {dimension_semantics = [#tpu.dimension_semantics<parallel>, #tpu.dimension_semantics<parallel>], iteration_bounds = array<i64: 2, 1>, scalar_prefetch = 1 : i64, scratch_operands = 0 : i64, tpu.core_type = #tpu.core_type<tc>, window_params = [{transform_indices = @transform_0, window_bounds = array<i64: 1, 8, 128>}, {transform_indices = @transform_1, window_bounds = array<i64: 1, 8, 128>}]} {
    %0 = arith.index_cast %arg0 : i32 to index
    %1 = memref.load %arg2[%0] : memref<2xi32, #tpu.memory_space<smem>>
    %c0_i32 = arith.constant 0 : i32
    %2 = arith.cmpi ne, %1, %c0_i32 : i32
    %cst = arith.constant 1.11111116 : f32
    %cst_0 = arith.constant 0.000000e+00 : f32
    %3 = arith.select %2, %cst, %cst_0 : f32
    %c0 = arith.constant 0 : index
    %c0_1 = arith.constant 0 : index
    %c0_2 = arith.constant 0 : index
    %4 = vector.load %arg3[%c0, %c0_1, %c0_2] : memref<1x8x128xf32, #tpu.memory_space<vmem>>, vector<1x8x128xf32>
    %5 = vector.broadcast %3 : f32 to vector<1x8x128xf32>
    %6 = arith.mulf %4, %5 : vector<1x8x128xf32>
    %c0_3 = arith.constant 0 : index
    %c0_4 = arith.constant 0 : index
    %c0_5 = arith.constant 0 : index
    %7 = vector.load %arg4[%c0_3, %c0_4, %c0_5] : memref<1x8x128xf32, #tpu.memory_space<vmem>>, vector<1x8x128xf32>
    tpu.vector_store %arg4[%c0_3, %c0_4, %c0_5], %6 {strides = array<i32>} : memref<1x8x128xf32, #tpu.memory_space<vmem>>, vector<1x8x128xf32>,
    return
  }
  func.func @transform_0(%arg0: i32, %arg1: i32, %arg2: memref<2xi32, #tpu.memory_space<smem>>) -> (i32, i32, i32) {
    %c0_i32 = arith.constant 0 : i32
    %c0_i32_0 = arith.constant 0 : i32
    return %arg0, %arg1, %c0_i32 : i32, i32, i32
  }
  func.func @transform_1(%arg0: i32, %arg1: i32, %arg2: memref<2xi32, #tpu.memory_space<smem>>) -> (i32, i32, i32) {
    %c0_i32 = arith.constant 0 : i32
    %c0_i32_0 = arith.constant 0 : i32
    return %arg0, %arg1, %c0_i32 : i32, i32, i32
  }
}

</mosaic_0001>

<bundles_post_ra>
// kernel: tpu_custom_call.1
= control target key start
LH: loop header
LB: loop body
LE: loop exit
PB: predicated region body
PF: predicated region fallthrough
CT: control target
= control target key end

     0   :  { %s468_s12 = smov [#allocation3]   ;;  %s608_s0 = inlined_call_operand.hbm [shape: s32[2], index: 0, kind: input, shape index: {}]   ;;  %s609_s1 = inlined_call_operand.hbm [shape: f32[2,8,128], index: 1, kind: input, shape index: {}]   ;;  %s610_s2 = inlined_call_operand.hbm [shape: f32[2,8,128], index: 2, kind: output, shape index: {}]  }
   0x1   :  { %s8_s11 = sshll.u32 %s608_s0, 4  ;;  %s9_s11 = int_to_ptr.hbm [resolvable:$true] %s8_s11 }
   0x2   :  { %11 = dma.hbm_to_smem %s9_s11, 16, %s468_s12, [#allocation2] }
   0x3   :  { %434 = dma.done.wait [#allocation2], 16 }
   0x4   :  { %435 = vsyncadd [#allocation2], 4294967280 }
   0x5   :  { %14 = sfence }
   0x6   :  { %15 = vsyncpa [#allocation5], 0 }
   0x7   :  { %17 = vsyncpa [#allocation5 + $0x1], 0 }
   0x8   :  { %18 = vsyncpa [#allocation6], 0 }
   0x9   :  { %20 = vsyncpa [#allocation6 + $0x1], 0  ;;  %s487_s13 = smov 0   ;;  %s489_s14 = smov 0  }
   0xa   :  { %s491_s15 = smov 0   ;;  %s493_s16 = smov 0  }
   0xb   :  { %s495_s17 = smov 0   ;;  %s497_s0 = smov 0  }
   0xc LB: > { %s264_s18 = sadd.s32 4294967295, %s466_s0   ;;  %s265_s19 = sadd.s32 4294967294, %s466_s0   ;;  %s466_s0 = sphi %s497_s0, %s26_s0   ;;  %s462_s17 = sphi %s495_s17, %s619_s17   ;;  %s458_s16 = sphi %s493_s16, %s618_s16   ;;  %s454_s15 = sphi %s491_s15, %s617_s15   ;;  %s450_s14 = sphi %s489_s14, %s616_s14   ;;  %s446_s13 = sphi %s487_s13, %s615_s13  }
   0xd   : > { %s38_s20 = sadd.s32 1, %s462_s17  ;;  %s47_s21 = sadd.s32 1, %s454_s15 }
   0xe   : > { %p40_p0 = scmp.ge.s32.totalorder %s38_s20, 2  ;;  %p54_p1 = scmp.ne.s32.totalorder %s454_s15, %s450_s14 }
   0xf   : > { %p55_p2 = scmp.eq.s32.totalorder %s466_s0, 0  ;;  %p60_p3 = scmp.ne.s32.totalorder %s450_s14, %s446_s13 }
  0x10   : > { %s621_s20 = smov (%p40_p0, %s38_s20), 0  ;;  %p61_p5 = scmp.eq.s32.totalorder %s264_s18, 0 }
  0x11   : > { %p528_p4 = por %p55_p2, %p54_p1  ;;  %s42_s23 = ssub.s32 %s462_s17, %s621_s20 }
  0x12   : > { %p86_p6 = scmp.eq.s32.totalorder %s264_s18, 1  ;;  %p45_p7 = scmp.eq.s32.totalorder %s42_s23, 0 }
  0x13   : > { %p534_p8 = por %p61_p5, %p60_p3  ;;  %p92_p10 = scmp.eq.s32.totalorder %s265_s19, 1 }
  0x14   : > { %p538_p9 = por %p86_p6, %p54_p1  ;;  %p267_p12 = scmp.ge.s32.totalorder %s466_s0, 2 }
  0x15   : > { %s543_s26 = scalar_select %p45_p7, %s454_s15, %s47_s21  }
  0x16   : > { %p545_p11 = por %p92_p10, %p60_p3  ;;  %p289_p13 = scmp.lt.s32.totalorder %s466_s0, 2 }
  0x17   : > { %s112_s28 = sand.u32 1, %s454_s15   ;;  %s269_s30 = sshll.u32 %s462_s17, 3 }
  0x18   : > { %s268_s29 = sshll.u32 %s112_s28, 3  ;;  %s121_s5 = scalar_lea.hbm %s609_s1, %s269_s30 }
  0x19   : > { %s116_s6 = scalar_lea.vmem [#allocation4], %s268_s29  ;;  %s123_s8 = sshll.u32 %s121_s5, 4  ;;  %s124_s8 = int_to_ptr.hbm [resolvable:$true] %s123_s8 }
  0x1a   : > { %s125_s7 = sshll.u32 %s116_s6, 4  ;;  %p282_p0 = pnand %p289_p13, %p528_p4  ;;  %s126_s7 = int_to_ptr.vmem [resolvable:$true] %s125_s7 }
  0x1b   : > { %p270_p1 = scmp.ge.s32.totalorder %s466_s0, 1  ;;  %p130_p2 = scmp.lt.s32.totalorder %s466_s0, 3 }
  0x1c   : > { %s113_s9 = scalar_lea.sflag [#allocation5], %s112_s28 }
  0x1d   : > { %284 = dma.hbm_to_vmem [thread:$0]  (!%p282_p0), %s124_s8, 128, %s126_s7, %s113_s9  }
  0x1e   : > { %p131_p3 = pnand %p270_p1, %p130_p2 }
  0x1f   : > { %s561_s10 = sand.u32 (!%p131_p3), 1, %s450_s14  }
  0x20   : > { %134 = sbr.rel (%p131_p3) target bundleno = 54 (0x36), region = 24  ;;  %s271_s11 = sshll.u32 (!%p131_p3), %s561_s10, 3 }
  0x21   : > { %s137_s12 = scalar_lea.sflag (!%p131_p3), [#allocation5], %s561_s10  ;;  %s140_s18 = scalar_lea.vmem (!%p131_p3), [#allocation4], %s271_s11 }
  0x25   : > { %437 = dma.done.wait (%p534_p8), %s137_s12, 128  }
  0x26   : > { %439 = vsyncadd (%p534_p8), %s137_s12, 4294967168  ;;  %s160_s19 = sld [smem:[#allocation3 + %s458_s16]]  ;;  %s274_s21 = sshll.u32 %s458_s16, 3  ;;  %v163_v0 = vld [vmem:[%s140_s18] sm:$0xff] }
  0x27   : > { %s179_s28 = scalar_lea.hbm %s610_s2, %s274_s21  ;;  %s159_s29 = scalar_lea.vmem [#allocation7], %s271_s11 }
  0x28   : > { %s181_s30 = sshll.u32 %s159_s29, 4  ;;  %s183_s3 = sshll.u32 %s179_s28, 4  ;;  %s182_s30 = int_to_ptr.vmem [resolvable:$true] %s181_s30  ;;  %s184_s3 = int_to_ptr.hbm [resolvable:$true] %s183_s3 }
  0x29   : > { %s168_s24 = scalar_lea.sflag [#allocation6], %s561_s10  ;;  %s396_s5 = sshra.s32 %s184_s3, 4  ;;  %s397_s5 = int_to_ptr.hbm [resolvable:$true] %s396_s5 }
  0x2a   : > { %s398_s16 = scalar_lea.hbm %s397_s5, 8  ;;  %s402_s8 = scalar_lea.hbm %s610_s2, 16 }
  0x2b   : > { %p399_p5 = scmp.ne.s32.totalorder %s397_s5, %s398_s16  ;;  %p403_p8 = scmp.lt.s32.totalorder %s397_s5, %s610_s2 }
  0x2c   : > { %p161_p4 = scmp.ne.s32.totalorder %s160_s19, 0  ;;  %p404_p10 = scmp.lt.s32.totalorder %s402_s8, %s398_s16 }
  0x2d   : > { %p400_p6 = pnand %p399_p5, %p538_p9 }
  0x2e   : > { %s162_s4 = scalar_select %p161_p4, 1.1111112, 0.0 }
  0x2f   : > { %p401_p7 = pneg %p400_p6  ;;  %p405_p13 = por %p404_p10, %p403_p8 }
  0x30   : > { %v164_v1 = vstv %s162_s4 }
  0x31   : > { %v165_v2 = vmul.f32 %v164_v1, %v163_v0  ;;  %p406_p0 = pnand %p405_p13, %p401_p7 }
  0x33   : > { %166 = vst [vmem:[%s159_s29] sm:$0xff] %v165_v2 }
  0x34   : > { %409 = shalt.err (!%p406_p0)
}
  0x35   : > { %279 = dma.vmem_to_hbm [thread:$0]  (%p538_p9), %s182_s30, 128, %s184_s3, %s168_s24  }
  0x36 PF: > { %s195_s10 = sand.u32 1, %s446_s13   ;;  %p286_p1 = pnand %p267_p12, %p545_p11 }
  0x37   : > { %s196_s12 = scalar_lea.sflag [#allocation6], %s195_s10 }
  0x38   : > { %p287_p2 = pneg %p286_p1 }
  0x3a   : > { %441 = dma.done.wait (%p287_p2), %s196_s12, 128  }
  0x3b   : > { %443 = vsyncadd (%p287_p2), %s196_s12, 4294967168  ;;  %s26_s0 = sadd.s32 1, %s466_s0   ;;  %s615_s13 = smov %s450_s14 }
  0x3c   : > { %p23_p3 = scmp.ge.s32.totalorder %s26_s0, 4   ;;  %s616_s14 = smov %s454_s15 }
  0x3d   : > { %s617_s15 = smov %s543_s26  ;;  %s618_s16 = smov %s462_s17 }
  0x3e   : > { %s619_s17 = smov %s621_s20  ;;  %25 = sbr.rel (!%p23_p3) target bundleno = 12 (0xc), region = 69 }
  0x43   :  { %202 = vsyncpa [#allocation5], 1 }
  0x44   :  { %204 = vsyncpa [#allocation5 + $0x1], 1 }
  0x45   :  { %205 = vsyncpa [#allocation6], 1 }
  0x46   :  { %207 = vsyncpa [#allocation6 + $0x1], 1 }

</bundles_post_ra>
